<compile_context>
chip_gen: v7x
topology: tpu7x:2x2x1
jax: 0.10.0
libtpu: 0.0.40
codegen_flags: <defaults>
</compile_context>

<pallas_src>
import jax
import jax.numpy as jnp
from jax.experimental import pallas as pl
from jax.experimental.pallas import tpu as pltpu


def _round_up(x, m):
    return ((x + m - 1) // m) * m


def _vmem_budget_bytes():
    """Generation-aware VMEM budget: ~70% of physical (v5e/v6e: ~89 MiB,
    v7x: ~45 MiB).  Falls back to a 64 MiB assumption if the query fails."""
    cap = 64 * 1024 * 1024
    try:
        cap = int(pltpu.get_tpu_info().vmem_capacity_bytes)
    except Exception:
        pass
    return max(int(cap * 0.70), 16 * 1024 * 1024)


def _conconv_kernel(x1_ref, x2_ref, w1_ref, w2_ref, b_ref, o_ref):
    # x1_ref: (bN, C1, T)   x2_ref: (bN, C2, T)   -- lane-dense spatial tiles
    # w1_ref: (P, C1)       w2_ref: (P, C2)       -- split 1x1-conv weight
    # b_ref : (P, 1)        o_ref : (bN, P, T)
    w1 = w1_ref[...]
    w2 = w2_ref[...]
    b = b_ref[...]
    # Static unroll over the (small) batch block; each image is a plain 2-D
    # MXU matmul with f32 accumulation, bias added in f32, narrowed at store.
    for i in range(o_ref.shape[0]):
        acc = jnp.dot(w2, x2_ref[i], preferred_element_type=jnp.float32)
        acc = acc + jnp.dot(w1, x1_ref[i], preferred_element_type=jnp.float32)
        o_ref[i] = (acc + b).astype(o_ref.dtype)


def conconv_forward(x1, x2, weight, bias, *, tile_hw=None, compute_dtype=None,
                    out_dtype=None, max_batch_block=16,
                    target_step_bytes=2 * 1024 * 1024):
    """ConConv forward: Conv2d(k=1, bias=True)(cat([x2, x1], dim=1)).

    x1: (N, C1, H, W), x2: (N, C2, H, W)  -- NCHW, PyTorch convention.
    weight: (planes, C1 + C2) squeezed 1x1 conv weight; the input-channel
            order is [x2 channels, x1 channels] (matches torch.cat([x2, x1], 1)).
    bias:   (planes,)
    tile_hw: optional spatial tile override (rounded to a multiple of 128);
             by default the tile / batch block are solved from the chip's VMEM.
    compute_dtype / out_dtype: optional narrower input / output dtypes
             (accumulation is always f32).  Defaults keep exact f32 semantics.
    Returns (N, planes, H, W) NCHW.
    """
    N, C1, H, W = x1.shape
    N2, C2, H2, W2s = x2.shape
    assert (N, H, W) == (N2, H2, W2s), "x1/x2 must share batch and spatial dims"
    planes, c_in = weight.shape
    assert c_in == C1 + C2
    HW = H * W

    # Free, contiguous reshapes (no padding, no extra HBM copies).
    x1f = x1.reshape(N, C1, HW)
    x2f = x2.reshape(N, C2, HW)

    # torch.cat([x2, x1], dim=1): first C2 weight columns act on x2, rest on x1.
    w2 = weight[:, :C2]
    w1 = weight[:, C2:]

    if compute_dtype is not None:
        x1f = x1f.astype(compute_dtype)
        x2f = x2f.astype(compute_dtype)
        w1 = w1.astype(compute_dtype)
        w2 = w2.astype(compute_dtype)
    else:
        w1 = w1.astype(x1f.dtype)
        w2 = w2.astype(x2f.dtype)
    b_col = bias.reshape(planes, 1).astype(jnp.float32)
    if out_dtype is None:
        out_dtype = x1.dtype

    in_bytes = jnp.dtype(x1f.dtype).itemsize
    out_bytes = jnp.dtype(out_dtype).itemsize
    c_tot = C1 + C2

    # --- VMEM accounting (with (8,128)-tile padding) -------------------------
    per_lane_hbm = c_tot * in_bytes + planes * out_bytes          # real HBM bytes/lane
    per_lane_vmem = ((_round_up(C1, 8) + _round_up(C2, 8)) * in_bytes
                     + _round_up(planes, 8) * out_bytes)          # VMEM bytes/lane
    weight_vmem = (2 * _round_up(planes, 8)
                   * (_round_up(C1, 128) + _round_up(C2, 128)) * in_bytes
                   + 2 * _round_up(planes, 8) * 128 * 4)          # dbl-buffered W + bias
    budget = _vmem_budget_bytes()
    max_lanes = max((budget - weight_vmem) // (2 * per_lane_vmem), 0)

    # --- spatial tile (lane axis, multiple of 128 or the full extent) --------
    hw_ceil = _round_up(HW, 128)
    if tile_hw is None:
        tile_cap = 32768                       # auto: as big as VMEM allows
    else:
        tile_cap = max(128, (int(tile_hw) // 128) * 128)
    tile = min(tile_cap, hw_ceil, (max_lanes // 128) * 128)
    tile = max(tile, 128)
    if tile >= HW:
        tile = HW                              # full-extent block: always legal
    n_hw = pl.cdiv(HW, tile)

    # --- batch block: amortize per-step overhead for small images ------------
    bN = 1
    if n_hw == 1:
        want = pl.cdiv(max(target_step_bytes // per_lane_hbm, 1), max(tile, 1))
        room = max(max_lanes // max(tile, 1), 1)
        bN = int(max(1, min(N, want, room, max_batch_block)))

    # --- keep >= 2 grid steps so v7x's two TensorCores both get work ---------
    steps = pl.cdiv(N, bN) * n_hw
    if steps < 2:
        if N >= 2:
            bN = pl.cdiv(N, 2)
        elif HW >= 256:
            tile = _round_up(pl.cdiv(HW, 2), 128)
            n_hw = pl.cdiv(HW, tile)

    # --- VMEM limit: never below the actual footprint (clamp tile, not limit) -
    need = 2 * bN * _round_up(tile, 128) * per_lane_vmem + weight_vmem
    vmem_limit = min(budget, max(2 * need, 16 * 1024 * 1024))
    vmem_limit = int(max(vmem_limit, need + (2 << 20)))

    grid = (pl.cdiv(N, bN), n_hw)

    out = pl.pallas_call(
        _conconv_kernel,
        out_shape=jax.ShapeDtypeStruct((N, planes, HW), out_dtype),
        grid_spec=pltpu.PrefetchScalarGridSpec(
            num_scalar_prefetch=0,
            grid=grid,
            in_specs=[
                pl.BlockSpec((bN, C1, tile), lambda n, j: (n, 0, j)),
                pl.BlockSpec((bN, C2, tile), lambda n, j: (n, 0, j)),
                pl.BlockSpec((planes, C1), lambda n, j: (0, 0)),
                pl.BlockSpec((planes, C2), lambda n, j: (0, 0)),
                pl.BlockSpec((planes, 1), lambda n, j: (0, 0)),
            ],
            out_specs=pl.BlockSpec((bN, planes, tile), lambda n, j: (n, 0, j)),
        ),
        compiler_params=pltpu.CompilerParams(
            dimension_semantics=("parallel", "parallel"),
            vmem_limit_bytes=vmem_limit,
        ),
    )(x1f, x2f, w1, w2, b_col)

    return out.reshape(N, planes, H, W)


def _reference(x1, x2, weight, bias):
    x_cat = jnp.concatenate([x2, x1], axis=1)
    return (jnp.einsum("nchw,oc->nohw", x_cat, weight)
            + bias[None, :, None, None])


if __name__ == "__main__":
    key = jax.random.PRNGKey(0)

    def make_case(key, N, C1, C2, planes, H, W):
        k1, k2, kw, kb, key = jax.random.split(key, 5)
        x1 = jax.random.normal(k1, (N, C1, H, W), dtype=jnp.float32)
        x2 = jax.random.normal(k2, (N, C2, H, W), dtype=jnp.float32)
        w = jax.random.normal(kw, (planes, C1 + C2), dtype=jnp.float32) * 0.1
        b = jax.random.normal(kb, (planes,), dtype=jnp.float32) * 0.1
        return key, x1, x2, w, b

    cases = [
        (2, 4, 4, 8, 16, 16),   # HW multiple of 128; batch split keeps 2 steps
        (2, 3, 5, 6, 10, 10),   # ragged HW < 128 -> full-extent spatial block
        (4, 3, 5, 6, 8, 8),     # tiny HW -> batch-blocked step (bN > 1)
        (1, 2, 2, 4, 20, 20),   # N=1 -> spatial split with partial last tile
    ]
    for (N, C1, C2, planes, H, W) in cases:
        key, x1, x2, w, b = make_case(key, N, C1, C2, planes, H, W)
        y = conconv_forward(x1, x2, w, b)
        jax.block_until_ready(y)
        y_ref = _reference(x1, x2, w, b)
        assert y.shape == (N, planes, H, W)
        assert jnp.allclose(y, y_ref, atol=1e-4, rtol=1e-4), (N, C1, C2, planes, H, W)

    # bf16 output store (f32 accumulation, narrowed only at the final store).
    key, x1, x2, w, b = make_case(key, 2, 4, 4, 8, 16, 16)
    y16 = conconv_forward(x1, x2, w, b, out_dtype=jnp.bfloat16)
    jax.block_until_ready(y16)
    y_ref = _reference(x1, x2, w, b)
    assert y16.dtype == jnp.bfloat16
    assert jnp.allclose(y16.astype(jnp.float32), y_ref, atol=5e-2, rtol=5e-2)

    print("KERNEL_OK")
</pallas_src>

<mosaic_0001>
module attributes {stable_mosaic.version = 11 : i64} {
  func.func @_conconv_kernel(%arg0: i32, %arg1: i32, %arg2: memref<1x4x256xf32, #tpu.memory_space<vmem>>, %arg3: memref<1x4x256xf32, #tpu.memory_space<vmem>>, %arg4: memref<8x4xf32, #tpu.memory_space<vmem>>, %arg5: memref<8x4xf32, #tpu.memory_space<vmem>>, %arg6: memref<8x1xf32, #tpu.memory_space<vmem>>, %arg7: memref<1x8x256xf32, #tpu.memory_space<vmem>>) attributes {dimension_semantics = [#tpu.dimension_semantics<parallel>, #tpu.dimension_semantics<parallel>], iteration_bounds = array<i64: 2, 1>, scalar_prefetch = 0 : i64, scratch_operands = 0 : i64, tpu.core_type = #tpu.core_type<tc>, window_params = [{transform_indices = @transform_0, window_bounds = array<i64: 1, 4, 256>}, {transform_indices = @transform_1, window_bounds = array<i64: 1, 4, 256>}, {pipeline_mode = #tpu.pipeline_mode<synchronous>, transform_indices = @transform_2, window_bounds = array<i64: 8, 4>}, {pipeline_mode = #tpu.pipeline_mode<synchronous>, transform_indices = @transform_3, window_bounds = array<i64: 8, 4>}, {pipeline_mode = #tpu.pipeline_mode<synchronous>, transform_indices = @transform_4, window_bounds = array<i64: 8, 1>}, {transform_indices = @transform_5, window_bounds = array<i64: 1, 8, 256>}]} {
    %c0 = arith.constant 0 : index
    %c0_0 = arith.constant 0 : index
    %0 = vector.load %arg4[%c0, %c0_0] : memref<8x4xf32, #tpu.memory_space<vmem>>, vector<8x4xf32>
    %c0_1 = arith.constant 0 : index
    %c0_2 = arith.constant 0 : index
    %1 = vector.load %arg5[%c0_1, %c0_2] : memref<8x4xf32, #tpu.memory_space<vmem>>, vector<8x4xf32>
    %c0_3 = arith.constant 0 : index
    %c0_4 = arith.constant 0 : index
    %2 = vector.load %arg6[%c0_3, %c0_4] : memref<8x1xf32, #tpu.memory_space<vmem>>, vector<8x1xf32>
    %c0_5 = arith.constant 0 : index
    %c0_6 = arith.constant 0 : index
    %c0_7 = arith.constant 0 : index
    %3 = vector.load %arg3[%c0_5, %c0_6, %c0_7] : memref<1x4x256xf32, #tpu.memory_space<vmem>>, vector<1x4x256xf32>
    %4 = vector.shape_cast %3 : vector<1x4x256xf32> to vector<4x256xf32>
    %cst = arith.constant dense<0.000000e+00> : vector<8x256xf32>
    %5 = tpu.matmul %1, %4, %cst {dimension_numbers = #tpu.dot_dimension_numbers<[1], [0], [0], [1], [0, 0, 1, 1], [], []>} : vector<8x4xf32>, vector<4x256xf32>, vector<8x256xf32> -> vector<8x256xf32>
    %c0_8 = arith.constant 0 : index
    %c0_9 = arith.constant 0 : index
    %c0_10 = arith.constant 0 : index
    %6 = vector.load %arg2[%c0_8, %c0_9, %c0_10] : memref<1x4x256xf32, #tpu.memory_space<vmem>>, vector<1x4x256xf32>
    %7 = vector.shape_cast %6 : vector<1x4x256xf32> to vector<4x256xf32>
    %cst_11 = arith.constant dense<0.000000e+00> : vector<8x256xf32>
    %8 = tpu.matmul %0, %7, %cst_11 {dimension_numbers = #tpu.dot_dimension_numbers<[1], [0], [0], [1], [0, 0, 1, 1], [], []>} : vector<8x4xf32>, vector<4x256xf32>, vector<8x256xf32> -> vector<8x256xf32>
    %9 = arith.addf %5, %8 : vector<8x256xf32>
    %10 = vector.broadcast %2 : vector<8x1xf32> to vector<8x256xf32>
    %11 = arith.addf %9, %10 : vector<8x256xf32>
    %c0_12 = arith.constant 0 : index
    %c0_13 = arith.constant 0 : index
    %c0_14 = arith.constant 0 : index
    %12 = vector.load %arg7[%c0_12, %c0_13, %c0_14] : memref<1x8x256xf32, #tpu.memory_space<vmem>>, vector<1x8x256xf32>
    %13 = vector.shape_cast %12 : vector<1x8x256xf32> to vector<8x256xf32>
    %14 = vector.shape_cast %11 : vector<8x256xf32> to vector<1x8x256xf32>
    tpu.vector_store %arg7[%c0_12, %c0_13, %c0_14], %14 {strides = array<i32>} : memref<1x8x256xf32, #tpu.memory_space<vmem>>, vector<1x8x256xf32>,
    return
  }
  func.func @transform_0(%arg0: i32, %arg1: i32) -> (i32, i32, i32) {
    %c0_i32 = arith.constant 0 : i32
    %c0_i32_0 = arith.constant 0 : i32
    return %arg0, %c0_i32, %arg1 : i32, i32, i32
  }
  func.func @transform_1(%arg0: i32, %arg1: i32) -> (i32, i32, i32) {
    %c0_i32 = arith.constant 0 : i32
    %c0_i32_0 = arith.constant 0 : i32
    return %arg0, %c0_i32, %arg1 : i32, i32, i32
  }
  func.func @transform_2(%arg0: i32, %arg1: i32) -> (i32, i32) {
    %c0_i32 = arith.constant 0 : i32
    %c0_i32_0 = arith.constant 0 : i32
    %c0_i32_1 = arith.constant 0 : i32
    return %c0_i32, %c0_i32_0 : i32, i32
  }
  func.func @transform_3(%arg0: i32, %arg1: i32) -> (i32, i32) {
    %c0_i32 = arith.constant 0 : i32
    %c0_i32_0 = arith.constant 0 : i32
    %c0_i32_1 = arith.constant 0 : i32
    return %c0_i32, %c0_i32_0 : i32, i32
  }
  func.func @transform_4(%arg0: i32, %arg1: i32) -> (i32, i32) {
    %c0_i32 = arith.constant 0 : i32
    %c0_i32_0 = arith.constant 0 : i32
    %c0_i32_1 = arith.constant 0 : i32
    return %c0_i32, %c0_i32_0 : i32, i32
  }
  func.func @transform_5(%arg0: i32, %arg1: i32) -> (i32, i32, i32) {
    %c0_i32 = arith.constant 0 : i32
    %c0_i32_0 = arith.constant 0 : i32
    return %arg0, %c0_i32, %arg1 : i32, i32, i32
  }
}

</mosaic_0001>

<bundles_post_ra>
// kernel: tpu_custom_call.1
= control target key start
LH: loop header
LB: loop body
LE: loop exit
PB: predicated region body
PF: predicated region fallthrough
CT: control target
= control target key end

     0   :  { %10 = vsyncpa [#allocation3], 0  ;;  %s900_s0 = inlined_call_operand.vmem [shape: f32[2,4,256], index: 0, kind: input, shape index: {}]   ;;  %s901_s1 = inlined_call_operand.vmem [shape: f32[2,4,256], index: 1, kind: input, shape index: {}]   ;;  %s902_s2 = inlined_call_operand.vmem [shape: f32[8,4], index: 2, kind: input, shape index: {}]   ;;  %s903_s3 = inlined_call_operand.vmem [shape: f32[8,4], index: 3, kind: input, shape index: {}]   ;;  %s904_s4 = inlined_call_operand.vmem [shape: f32[8,1], index: 4, kind: input, shape index: {}]   ;;  %s905_s5 = inlined_call_operand.hbm [shape: f32[2,8,256], index: 5, kind: output, shape index: {}]  }
   0x1   :  { %12 = vsyncpa [#allocation3 + $0x1], 0  ;;  %s776_s18 = smov 0   ;;  %s778_s19 = smov 0  }
   0x2   :  { %s780_s20 = smov 0   ;;  %s782_s21 = smov 0  }
   0x3   :  { %s784_s22 = smov 0   ;;  %s786_s23 = smov 0  }
   0x4 LB: > { %s577_s24 = sadd.s32 4294967295, %s741_s23   ;;  %s578_s25 = sadd.s32 4294967294, %s741_s23   ;;  %s741_s23 = sphi %s786_s23, %s18_s23   ;;  %s737_s22 = sphi %s784_s22, %s912_s22   ;;  %s733_s21 = sphi %s782_s21, %s911_s21   ;;  %s729_s20 = sphi %s780_s20, %s910_s20   ;;  %s725_s19 = sphi %s778_s19, %s909_s19   ;;  %s721_s18 = sphi %s776_s18, %s908_s18  }
   0x5   : > { %s30_s26 = sadd.s32 1, %s737_s22  ;;  %s158_s27 = sadd.s32 1, %s729_s20 }
   0x6   : > { %p32_p0 = scmp.ge.s32.totalorder %s30_s26, 2  ;;  %p168_p1 = scmp.ne.s32.totalorder %s729_s20, %s725_s19 }
   0x7   : > { %p169_p2 = scmp.eq.s32.totalorder %s577_s24, 1  ;;  %p174_p3 = scmp.ne.s32.totalorder %s725_s19, %s721_s18 }
   0x8   : > { %s914_s26 = smov (%p32_p0, %s30_s26), 0  ;;  %p175_p5 = scmp.eq.s32.totalorder %s578_s25, 1 }
   0x9   : > { %p816_p4 = por %p169_p2, %p168_p1  ;;  %s153_s29 = ssub.s32 %s737_s22, %s914_s26 }
   0xa   : > { %p581_p6 = scmp.ge.s32.totalorder %s741_s23, 1  ;;  %p156_p7 = scmp.eq.s32.totalorder %s153_s29, 0 }
   0xb   : > { %p823_p8 = por %p175_p5, %p174_p3  ;;  %p228_p9 = scmp.lt.s32.totalorder %s741_s23, 3 }
   0xc   : > { %s829_s6 = scalar_select %p156_p7, %s729_s20, %s158_s27  }
   0xd   : > { %p229_p10 = pnand %p581_p6, %p228_p9 }
   0xe   : > { %p270_p11 = scmp.lt.s32.totalorder (!%p229_p10), %s733_s21, 1  ;;  %v743_v0 = vmov (!%p229_p10), 0.0   ;;  %v292_v1 = vld [vmem:[%s904_s4] sm:$0xff] (!%p229_p10)  ;;  %v744_v2 = vmov (!%p229_p10), 0   ;;  %vm301_vm0 = vcmask (!%p229_p10), 1043456   ;;  %vm297_vm1 = vcmask (!%p229_p10), 31744  }
   0xf   : > { %232 = sbr.rel (%p229_p10) target bundleno = 263 (0x107), region = 40  ;;  %370 = vmatprep.mubr.f32.mxu1 (!%p229_p10), %v743_v0  ;;  %450 = vmatprep.mubr.f32.mxu0 (!%p229_p10), %v743_v0  ;;  %v290_v7 = vld [vmem:[%s902_s2] sm:$0xff] (!%p229_p10)  ;;  %s266_s29 = sand.u32 (!%p229_p10), 1, %s725_s19  }
  0x10   : > { %660 = vset.pattern.permute.xlu0 (!%p229_p10), %v744_v2  ;;  %v291_v8 = vld [vmem:[%s903_s3] sm:$0xff] (!%p229_p10)  ;;  %s582_s7 = sshll.u32 (!%p229_p10), %s266_s29, 4  ;;  %s600_s8 = sshll.u32 (!%p229_p10), %s733_s21, 8 }
  0x11   : > { %459 = vperm.xlu0 (!%p229_p10), %660, %v292_v1   ;;  %s467_s14 = scalar_lea.sflag (!%p229_p10), [#allocation3], %s266_s29 }
  0x16   : > { %s271_s9 = scalar_select %p270_p11, %s733_s21, 1 }
  0x17   : > { %s745_s21 = smov [#allocation2]  }
  0x18   : > { %s598_s10 = sshll.u32 %s271_s9, 3  ;;  %s268_s9 = scalar_lea.vmem [#allocation2], %s582_s7 }
  0x19   : > { %s277_s13 = scalar_lea.vmem %s900_s0, %s598_s10  ;;  %s287_s16 = scalar_lea.vmem %s901_s1, %s598_s10 }
  0x1a   : > { %v294_v3 = vld [vmem:[%s277_s13] sm:$0xff]  ;;  %s483_s10 = sshll.u32 %s268_s9, 4  ;;  %s853_s13 = scalar_lea.hbm %s905_s5, %s600_s8  ;;  %s855_s10 = int_to_ptr.vmem [resolvable:$true] %s483_s10 }
  0x1b   : > { %v293_v4 = vld [vmem:[%s287_s16] sm:$0xff]  ;;  %v296_v5 = vcombine.high %v294_v3, %v294_v3  ;;  %s663_s15 = scalar_lea.vmem %s855_s10, 256  ;;  %s667_s16 = sshll.u32 %s745_s21, 4  ;;  %s668_s16 = int_to_ptr.vmem [resolvable:$false] %s667_s16 }
  0x1c   : > { %v378_v6 = vcombine.high %v293_v4, %v293_v4  ;;  %p664_p12 = scmp.ne.s32.totalorder %s855_s10, %s663_s15  ;;  %s669_s17 = scalar_lea.vmem %s668_s16, 512 }
  0x1d   : > { %587 = vmatprep.subr.msk.mxu1 %vm301_vm0, %v296_v5  ;;  %p670_p1 = scmp.lt.s32.totalorder %s855_s10, %s668_s16  ;;  %p671_p2 = scmp.lt.s32.totalorder %s669_s17, %s663_s15 }
  0x1e   : > { %590 = vmatprep.subr.msk.mxu0 %vm301_vm0, %v378_v6  ;;  %588 = vmatpush1.msk.msra.mxu1 %vm301_vm0, %v294_v3  ;;  %p665_p13 = pnand %p664_p12, %p816_p4 }
  0x1f   : > { %591 = vmatpush1.msk.msra.mxu0 %vm301_vm0, %v293_v4  ;;  %589 = vmatmul.mubr.msk.f32.vlgmr.msra.gmra.mrb[0].mxu1 %vm297_vm1, %v290_v7  ;;  %p672_p3 = por %p671_p2, %p670_p1 }
  0x20   : > { %592 = vmatmul.mubr.msk.f32.vlgmr.msra.gmra.mrb[0].mxu0 %vm297_vm1, %v291_v8  ;;  %p666_p0 = pneg %p665_p13 }
  0x22   : > { %p673_p5 = pnand %p672_p3, %p666_p0 }
  0x90   : > { %v460_v9 = vpop.permute.xlu0 %459 }
  0xf2   : > { %v372_v10 = vpop.f32.mrb[0].mxu1 }
  0xf3   : > { %v452_v11 = vpop.f32.mrb[0].mxu0  ;;  %v374_v13 = vpop.f32.mrb[1].mxu1 }
  0xf4   : > { %v453_v12 = vadd.f32 %v452_v11, %v372_v10  ;;  %v454_v14 = vpop.f32.mrb[1].mxu0 }
  0xf5   : > { %v455_v15 = vadd.f32 %v454_v14, %v374_v13 }
  0xf6   : > { %v462_v16 = vadd.f32 %v460_v9, %v453_v12 }
  0xf7   : > { %v463_v17 = vadd.f32 %v460_v9, %v455_v15 }
  0xf8   : > { %464 = vst [vmem:[%s268_s9] sm:$0xff] %v462_v16 }
  0xf9   : > { %465 = vst [vmem:[%s268_s9 + $0x8] sm:$0xff] %v463_v17 }
  0xfa   : > { %676 = shalt.err (!%p673_p5)
}
  0xfb   : > { %s677_s24 = scalar_lea.hbm %s853_s13, 256  ;;  %s681_s29 = scalar_lea.hbm %s905_s5, 512 }
  0xfc   : > { %p678_p6 = scmp.ne.s32.totalorder %s853_s13, %s677_s24  ;;  %p682_p10 = scmp.lt.u32.totalorder %s853_s13, %s905_s5 }
  0xfd   : > { %p683_p11 = scmp.lt.u32.totalorder %s681_s29, %s677_s24  ;;  %p685_p13 = scmp.lt.u32.totalorder %s677_s24, %s853_s13 }
  0xfe   : > { %p679_p7 = pnand %p678_p6, %p816_p4 }
  0xff   : > { %p684_p12 = por %p683_p11, %p682_p10 }
 0x100   : > { %p680_p9 = pneg %p679_p7 }
 0x101   : > { %p686_p0 = por %p685_p13, %p684_p12 }
 0x103   : > { %p687_p1 = pnand %p686_p0, %p680_p9 }
 0x105   : > { %690 = shalt.err (!%p687_p1)
}
 0x106   : > { %603 = dma.vmem_to_hbm [thread:$0]  (%p816_p4), %s855_s10, 256, %s853_s13, %s467_s14  }
 0x107 PF: > { %p609_p2 = scmp.ge.s32.totalorder %s741_s23, 2  ;;  %s495_s9 = sand.u32 1, %s721_s18  }
 0x108   : > { %s496_s11 = scalar_lea.sflag [#allocation3], %s495_s9 }
 0x109   : > { %p606_p3 = pnand %p609_p2, %p823_p8 }
 0x10b   : > { %716 = dma.done.wait (!%p606_p3), %s496_s11, 256  }
 0x10c   : > { %718 = vsyncadd (!%p606_p3), %s496_s11, 4294967040  ;;  %s18_s23 = sadd.s32 1, %s741_s23   ;;  %s908_s18 = smov %s725_s19 }
 0x10d   : > { %p15_p5 = scmp.ge.s32.totalorder %s18_s23, 4   ;;  %s909_s19 = smov %s729_s20 }
 0x10e   : > { %s910_s20 = smov %s829_s6  ;;  %s911_s21 = smov %s737_s22 }
 0x10f   : > { %s912_s22 = smov %s914_s26  ;;  %17 = sbr.rel (!%p15_p5) target bundleno = 4 (0x4), region = 78 }
 0x116   :  { %501 = vsyncpa [#allocation3], 1 }
 0x117   :  { %503 = vsyncpa [#allocation3 + $0x1], 1 }

</bundles_post_ra>
